<compile_context>
chip_gen: v6e
topology: v6e:2x2x1
jax: 0.10.0
libtpu: 0.0.40
codegen_flags: <defaults>
</compile_context>

<pallas_src>
import numpy as np
import jax
import jax.numpy as jnp
from jax import lax
from jax.experimental import pallas as pl
from jax.experimental.pallas import tpu as pltpu

HIGHEST = jax.lax.Precision.HIGHEST

C1 = 12                       # conv1 output channels
PH = PW = 4                   # pooled spatial dims
CORNER = PH * PW * C1         # 192 live lanes per pooling corner
CORNER_PAD = 256              # corner slab padded to a multiple of 128 lanes
C2 = 24                       # conv2/conv3 channels
F = 2 * 2 * C2                # 96 flattened features
FP = 128                      # padded feature width
OUT_PAD = 128                 # lane-dense output slab (real outputs in [:, :3])


def net_kernel(x_ref, m1_ref, b1_ref, m2_ref, b2_ref, m3_ref, b3_ref,
               wl1_ref, bl1_ref, wl2_ref, bl2_ref, out_ref):
    f32, bf16 = jnp.float32, jnp.bfloat16
    x = x_ref[...].astype(bf16)                            # (TB, 42) = 7*6 pixels

    # conv1 (3x3, pad 2) folded into a (42 -> 4*256) matmul with corner-major
    # output columns, + bias, ReLU.
    h1 = jnp.dot(x, m1_ref[...], preferred_element_type=f32)
    h1 = jnp.maximum(h1 + b1_ref[...], 0.0)                # (TB, 1024)

    # 2x2 max-pool == elementwise max over the four lane-aligned corner slabs
    # (pure VPU; no selection matmuls).
    pooled = jnp.maximum(
        jnp.maximum(h1[:, 0:CORNER_PAD], h1[:, CORNER_PAD:2 * CORNER_PAD]),
        jnp.maximum(h1[:, 2 * CORNER_PAD:3 * CORNER_PAD], h1[:, 3 * CORNER_PAD:]))
    # (TB, 256): lanes 0..191 live, 192..255 zero.

    # conv2 (3x3 valid) folded into a (256 -> 128) matmul, + bias, ReLU.
    h2 = jnp.dot(pooled.astype(bf16), m2_ref[...], preferred_element_type=f32)
    h2 = jnp.maximum(h2 + b2_ref[...], 0.0)                # (TB, 128): lanes 96.. zero

    # conv3 (1x1) == block-diagonal (128,128) matmul, + bias, ReLU; residual add.
    h3 = jnp.dot(h2.astype(bf16), m3_ref[...], preferred_element_type=f32)
    h3 = jnp.maximum(h3 + b3_ref[...], 0.0)
    flat = h2 + h3                                         # (TB, 128)

    # layer1 (residual folded into the weight: Wk1 + I) -> tanh -> layer2.
    y1 = jnp.dot(flat.astype(bf16), wl1_ref[...], preferred_element_type=f32)
    t = jnp.tanh(y1 + bl1_ref[...])
    out = jnp.dot(t.astype(bf16), wl2_ref[...], preferred_element_type=f32)
    out_ref[...] = out + bl2_ref[...]                      # (TB, 128); cols 3.. unused


def fold_params(params):
    """Fold conv weights into dense matrices with lane-friendly layouts (pure glue)."""
    (w1, b1, w2, b2, w3, b3, Wl1, bl1, Wl2, bl2) = [np.asarray(p, np.float32) for p in params]

    # conv1: (B,1,7,6) --k3,p2--> 12x9x8, restricted to the 8x8 pooling region
    # and laid out corner-major: corner k=(di,dj) owns lanes [k*256, k*256+192)
    # with inner order (pi, pj, c).
    M1 = np.zeros((7 * 6, 4 * CORNER_PAD), np.float32)
    b1r = np.zeros((1, 4 * CORNER_PAD), np.float32)
    for k, (di, dj) in enumerate(((0, 0), (0, 1), (1, 0), (1, 1))):
        b1r[0, k * CORNER_PAD:k * CORNER_PAD + CORNER] = np.tile(b1, PH * PW)
        for pi in range(PH):
            for pj in range(PW):
                i, j = 2 * pi + di, 2 * pj + dj            # conv1 output pixel
                col = k * CORNER_PAD + (pi * PW + pj) * C1
                for ki in range(3):
                    for kj in range(3):
                        hi, wj = i + ki - 2, j + kj - 2    # input pixel (pad 2)
                        if 0 <= hi < 7 and 0 <= wj < 6:
                            M1[hi * 6 + wj, col:col + C1] += w1[:, 0, ki, kj]

    # conv2: 12x4x4 pooled (lanes 0..191 of the 256-wide pooled slab) --k3 valid-->
    # 24x2x2, laid out (h, w, c) in lanes 0..95 of a 128-wide slab.
    M2 = np.zeros((CORNER_PAD, FP), np.float32)
    for i in range(2):
        for j in range(2):
            for ki in range(3):
                for kj in range(3):
                    r0 = ((i + ki) * PW + (j + kj)) * C1
                    c0 = (i * 2 + j) * C2
                    M2[r0:r0 + C1, c0:c0 + C2] += w2[:, :, ki, kj].T
    b2r = np.zeros((1, FP), np.float32)
    b2r[0, :F] = np.tile(b2, 4)

    # conv3: 1x1 -> block-diagonal over the 4 spatial positions.
    M3 = np.zeros((FP, FP), np.float32)
    for p in range(4):
        M3[p * C2:(p + 1) * C2, p * C2:(p + 1) * C2] = w3[:, :, 0, 0].T
    b3r = np.zeros((1, FP), np.float32)
    b3r[0, :F] = np.tile(b3, 4)

    # PyTorch flattens NCHW (c,h,w); the kernel's feature axis is (h,w,c).
    # Permute the Linear weights so outputs match PyTorch exactly, and fold
    # the residual add (tanh(layer1(x) + x)) into the weight (Wk1 + I).
    perm = np.zeros(F, np.int64)
    for h in range(2):
        for w in range(2):
            for c in range(C2):
                perm[(h * 2 + w) * C2 + c] = c * 4 + h * 2 + w
    Wk1 = np.zeros((FP, FP), np.float32)
    Wk1[:F, :F] = Wl1[np.ix_(perm, perm)].T + np.eye(F, dtype=np.float32)
    bk1 = np.zeros((1, FP), np.float32)
    bk1[0, :F] = bl1[perm]

    # layer2, padded to a lane-dense 128-wide output slab (cols 0..2 real).
    Wk2 = np.zeros((FP, OUT_PAD), np.float32)
    Wk2[:F, :3] = Wl2[:, perm].T
    bk2 = np.zeros((1, OUT_PAD), np.float32)
    bk2[0, :3] = bl2

    M1, M2, M3, Wk1, Wk2 = [jnp.asarray(a, jnp.bfloat16) for a in (M1, M2, M3, Wk1, Wk2)]
    b1r, b2r, b3r, bk1, bk2 = [jnp.asarray(a, jnp.float32) for a in (b1r, b2r, b3r, bk1, bk2)]
    return (M1, b1r, M2, b2r, M3, b3r, Wk1, bk1, Wk2, bk2)


def _round_up(n, m):
    return ((n + m - 1) // m) * m


def net_forward(x, folded, *, tb=512):
    x2 = x.reshape(-1, 7 * 6).astype(jnp.float32)          # == x.view(-1, 1, 7, 6)
    B = x2.shape[0]
    TB = min(tb, _round_up(max(B, 1), 8))                  # sublane-aligned batch tile
    Bp = _round_up(B, TB)
    if Bp != B:
        x2 = jnp.pad(x2, ((0, Bp - B), (0, 0)))

    const = lambda i: (0, 0)                               # weights resident across steps
    out = pl.pallas_call(
        net_kernel,
        out_shape=jax.ShapeDtypeStruct((Bp, OUT_PAD), jnp.float32),
        grid=(Bp // TB,),
        in_specs=[pl.BlockSpec((TB, 7 * 6), lambda i: (i, 0))]
                 + [pl.BlockSpec(a.shape, const) for a in folded],
        out_specs=pl.BlockSpec((TB, OUT_PAD), lambda i: (i, 0)),
        compiler_params=pltpu.CompilerParams(
            dimension_semantics=("parallel",)),
    )(x2, *folded)
    return out[:B, :3]


def reference_forward(x, params):
    """Pure-JAX f32 reference matching the PyTorch module."""
    w1, b1, w2, b2, w3, b3, Wl1, bl1, Wl2, bl2 = params
    xi = x.reshape(-1, 1, 7, 6).astype(jnp.float32)
    dn = ('NCHW', 'OIHW', 'NCHW')
    y = lax.conv_general_dilated(xi, w1, (1, 1), [(2, 2), (2, 2)],
                                 dimension_numbers=dn, precision=HIGHEST)
    y = jnp.maximum(y + b1[None, :, None, None], 0.0)
    y = lax.reduce_window(y, -jnp.inf, lax.max, (1, 1, 2, 2), (1, 1, 2, 2), 'VALID')
    y = lax.conv_general_dilated(y, w2, (1, 1), 'VALID',
                                 dimension_numbers=dn, precision=HIGHEST)
    y = jnp.maximum(y + b2[None, :, None, None], 0.0)
    z = lax.conv_general_dilated(y, w3, (1, 1), 'VALID',
                                 dimension_numbers=dn, precision=HIGHEST)
    z = jnp.maximum(z + b3[None, :, None, None], 0.0)
    y = y + z
    flat = y.reshape(y.shape[0], -1)
    h = jnp.dot(flat, Wl1.T, precision=HIGHEST) + bl1
    t = jnp.tanh(h + flat)
    return jnp.dot(t, Wl2.T, precision=HIGHEST) + bl2


if __name__ == "__main__":
    key = jax.random.PRNGKey(0)
    kp, kx1, kx2 = jax.random.split(key, 3)
    ks = jax.random.split(kp, 10)

    def init(k, shape, scale=0.1):
        return scale * jax.random.normal(k, shape, dtype=jnp.float32)

    # Deterministic synthetic parameters (same shapes as the PyTorch module).
    params = (
        init(ks[0], (12, 1, 3, 3)), init(ks[1], (12,)),      # conv1
        init(ks[2], (24, 12, 3, 3)), init(ks[3], (24,)),     # conv2
        init(ks[4], (24, 24, 1, 1)), init(ks[5], (24,)),     # conv3
        init(ks[6], (96, 96)), init(ks[7], (96,)),           # layer1
        init(ks[8], (3, 96)), init(ks[9], (3,)),             # layer2
    )
    folded = fold_params(params)

    # B=2: tiny batch (padded to 8 rows).  B=700: exercises grid=2 + batch pad.
    # Tolerance covers bf16-MXU kernel vs f32-HIGHEST reference.
    for kx, B in ((kx1, 2), (kx2, 700)):
        x = jax.random.normal(kx, (B, 1, 7, 6), dtype=jnp.float32)
        out = jax.block_until_ready(net_forward(x, folded))
        ref = jax.block_until_ready(reference_forward(x, params))
        assert out.shape == (B, 3)
        np.testing.assert_allclose(np.asarray(out), np.asarray(ref),
                                   atol=2e-2, rtol=2e-2)
    print("KERNEL_OK")
</pallas_src>

<mosaic_0001>
module attributes {stable_mosaic.version = 11 : i64} {
  func.func @net_kernel(%arg0: i32, %arg1: memref<8x42xf32, #tpu.memory_space<vmem>>, %arg2: memref<42x1024xbf16, #tpu.memory_space<vmem>>, %arg3: memref<1x1024xf32, #tpu.memory_space<vmem>>, %arg4: memref<256x128xbf16, #tpu.memory_space<vmem>>, %arg5: memref<1x128xf32, #tpu.memory_space<vmem>>, %arg6: memref<128x128xbf16, #tpu.memory_space<vmem>>, %arg7: memref<1x128xf32, #tpu.memory_space<vmem>>, %arg8: memref<128x128xbf16, #tpu.memory_space<vmem>>, %arg9: memref<1x128xf32, #tpu.memory_space<vmem>>, %arg10: memref<128x128xbf16, #tpu.memory_space<vmem>>, %arg11: memref<1x128xf32, #tpu.memory_space<vmem>>, %arg12: memref<8x128xf32, #tpu.memory_space<vmem>>) attributes {dimension_semantics = [#tpu.dimension_semantics<parallel>], iteration_bounds = array<i64: 1>, scalar_prefetch = 0 : i64, scratch_operands = 0 : i64, tpu.core_type = #tpu.core_type<tc>, window_params = [{transform_indices = @transform_0, window_bounds = array<i64: 8, 42>}, {pipeline_mode = #tpu.pipeline_mode<synchronous>, transform_indices = @transform_1, window_bounds = array<i64: 42, 1024>}, {pipeline_mode = #tpu.pipeline_mode<synchronous>, transform_indices = @transform_2, window_bounds = array<i64: 1, 1024>}, {pipeline_mode = #tpu.pipeline_mode<synchronous>, transform_indices = @transform_3, window_bounds = array<i64: 256, 128>}, {pipeline_mode = #tpu.pipeline_mode<synchronous>, transform_indices = @transform_4, window_bounds = array<i64: 1, 128>}, {pipeline_mode = #tpu.pipeline_mode<synchronous>, transform_indices = @transform_5, window_bounds = array<i64: 128, 128>}, {pipeline_mode = #tpu.pipeline_mode<synchronous>, transform_indices = @transform_6, window_bounds = array<i64: 1, 128>}, {pipeline_mode = #tpu.pipeline_mode<synchronous>, transform_indices = @transform_7, window_bounds = array<i64: 128, 128>}, {pipeline_mode = #tpu.pipeline_mode<synchronous>, transform_indices = @transform_8, window_bounds = array<i64: 1, 128>}, {pipeline_mode = #tpu.pipeline_mode<synchronous>, transform_indices = @transform_9, window_bounds = array<i64: 128, 128>}, {pipeline_mode = #tpu.pipeline_mode<synchronous>, transform_indices = @transform_10, window_bounds = array<i64: 1, 128>}, {transform_indices = @transform_11, window_bounds = array<i64: 8, 128>}]} {
    %c0 = arith.constant 0 : index
    %c0_0 = arith.constant 0 : index
    %0 = vector.load %arg1[%c0, %c0_0] : memref<8x42xf32, #tpu.memory_space<vmem>>, vector<8x42xf32>
    %1 = arith.truncf %0 : vector<8x42xf32> to vector<8x42xbf16>
    %c0_1 = arith.constant 0 : index
    %c0_2 = arith.constant 0 : index
    %2 = vector.load %arg2[%c0_1, %c0_2] : memref<42x1024xbf16, #tpu.memory_space<vmem>>, vector<42x1024xbf16>
    %cst = arith.constant dense<0.000000e+00> : vector<8x1024xf32>
    %3 = tpu.matmul %1, %2, %cst {dimension_numbers = #tpu.dot_dimension_numbers<[1], [0], [0], [1], [0, 0, 1, 1], [], []>} : vector<8x42xbf16>, vector<42x1024xbf16>, vector<8x1024xf32> -> vector<8x1024xf32>
    %c0_3 = arith.constant 0 : index
    %c0_4 = arith.constant 0 : index
    %4 = vector.load %arg3[%c0_3, %c0_4] : memref<1x1024xf32, #tpu.memory_space<vmem>>, vector<1x1024xf32>
    %5 = vector.broadcast %4 : vector<1x1024xf32> to vector<8x1024xf32>
    %6 = arith.addf %3, %5 : vector<8x1024xf32>
    %cst_5 = arith.constant 0.000000e+00 : f32
    %7 = vector.broadcast %cst_5 : f32 to vector<8x1024xf32>
    %8 = arith.maximumf %6, %7 : vector<8x1024xf32>
    %9 = vector.extract_strided_slice %8 {offsets = [0, 0], sizes = [8, 256], strides = [1, 1]} : vector<8x1024xf32> to vector<8x256xf32>
    %10 = vector.extract_strided_slice %8 {offsets = [0, 256], sizes = [8, 256], strides = [1, 1]} : vector<8x1024xf32> to vector<8x256xf32>
    %11 = arith.maximumf %9, %10 : vector<8x256xf32>
    %12 = vector.extract_strided_slice %8 {offsets = [0, 512], sizes = [8, 256], strides = [1, 1]} : vector<8x1024xf32> to vector<8x256xf32>
    %13 = vector.extract_strided_slice %8 {offsets = [0, 768], sizes = [8, 256], strides = [1, 1]} : vector<8x1024xf32> to vector<8x256xf32>
    %14 = arith.maximumf %12, %13 : vector<8x256xf32>
    %15 = arith.maximumf %11, %14 : vector<8x256xf32>
    %16 = arith.truncf %15 : vector<8x256xf32> to vector<8x256xbf16>
    %c0_6 = arith.constant 0 : index
    %c0_7 = arith.constant 0 : index
    %17 = vector.load %arg4[%c0_6, %c0_7] : memref<256x128xbf16, #tpu.memory_space<vmem>>, vector<256x128xbf16>
    %cst_8 = arith.constant dense<0.000000e+00> : vector<8x128xf32>
    %18 = tpu.matmul %16, %17, %cst_8 {dimension_numbers = #tpu.dot_dimension_numbers<[1], [0], [0], [1], [0, 0, 1, 1], [], []>} : vector<8x256xbf16>, vector<256x128xbf16>, vector<8x128xf32> -> vector<8x128xf32>
    %c0_9 = arith.constant 0 : index
    %c0_10 = arith.constant 0 : index
    %19 = vector.load %arg5[%c0_9, %c0_10] : memref<1x128xf32, #tpu.memory_space<vmem>>, vector<1x128xf32>
    %20 = vector.broadcast %19 : vector<1x128xf32> to vector<8x128xf32>
    %21 = arith.addf %18, %20 : vector<8x128xf32>
    %cst_11 = arith.constant 0.000000e+00 : f32
    %22 = vector.broadcast %cst_11 : f32 to vector<8x128xf32>
    %23 = arith.maximumf %21, %22 : vector<8x128xf32>
    %24 = arith.truncf %23 : vector<8x128xf32> to vector<8x128xbf16>
    %c0_12 = arith.constant 0 : index
    %c0_13 = arith.constant 0 : index
    %25 = vector.load %arg6[%c0_12, %c0_13] : memref<128x128xbf16, #tpu.memory_space<vmem>>, vector<128x128xbf16>
    %cst_14 = arith.constant dense<0.000000e+00> : vector<8x128xf32>
    %26 = tpu.matmul %24, %25, %cst_14 {dimension_numbers = #tpu.dot_dimension_numbers<[1], [0], [0], [1], [0, 0, 1, 1], [], []>} : vector<8x128xbf16>, vector<128x128xbf16>, vector<8x128xf32> -> vector<8x128xf32>
    %c0_15 = arith.constant 0 : index
    %c0_16 = arith.constant 0 : index
    %27 = vector.load %arg7[%c0_15, %c0_16] : memref<1x128xf32, #tpu.memory_space<vmem>>, vector<1x128xf32>
    %28 = vector.broadcast %27 : vector<1x128xf32> to vector<8x128xf32>
    %29 = arith.addf %26, %28 : vector<8x128xf32>
    %cst_17 = arith.constant 0.000000e+00 : f32
    %30 = vector.broadcast %cst_17 : f32 to vector<8x128xf32>
    %31 = arith.maximumf %29, %30 : vector<8x128xf32>
    %32 = arith.addf %23, %31 : vector<8x128xf32>
    %33 = arith.truncf %32 : vector<8x128xf32> to vector<8x128xbf16>
    %c0_18 = arith.constant 0 : index
    %c0_19 = arith.constant 0 : index
    %34 = vector.load %arg8[%c0_18, %c0_19] : memref<128x128xbf16, #tpu.memory_space<vmem>>, vector<128x128xbf16>
    %cst_20 = arith.constant dense<0.000000e+00> : vector<8x128xf32>
    %35 = tpu.matmul %33, %34, %cst_20 {dimension_numbers = #tpu.dot_dimension_numbers<[1], [0], [0], [1], [0, 0, 1, 1], [], []>} : vector<8x128xbf16>, vector<128x128xbf16>, vector<8x128xf32> -> vector<8x128xf32>
    %c0_21 = arith.constant 0 : index
    %c0_22 = arith.constant 0 : index
    %36 = vector.load %arg9[%c0_21, %c0_22] : memref<1x128xf32, #tpu.memory_space<vmem>>, vector<1x128xf32>
    %37 = vector.broadcast %36 : vector<1x128xf32> to vector<8x128xf32>
    %38 = arith.addf %35, %37 : vector<8x128xf32>
    %39 = math.tanh %38 : vector<8x128xf32>
    %40 = arith.truncf %39 : vector<8x128xf32> to vector<8x128xbf16>
    %c0_23 = arith.constant 0 : index
    %c0_24 = arith.constant 0 : index
    %41 = vector.load %arg10[%c0_23, %c0_24] : memref<128x128xbf16, #tpu.memory_space<vmem>>, vector<128x128xbf16>
    %cst_25 = arith.constant dense<0.000000e+00> : vector<8x128xf32>
    %42 = tpu.matmul %40, %41, %cst_25 {dimension_numbers = #tpu.dot_dimension_numbers<[1], [0], [0], [1], [0, 0, 1, 1], [], []>} : vector<8x128xbf16>, vector<128x128xbf16>, vector<8x128xf32> -> vector<8x128xf32>
    %c0_26 = arith.constant 0 : index
    %c0_27 = arith.constant 0 : index
    %43 = vector.load %arg11[%c0_26, %c0_27] : memref<1x128xf32, #tpu.memory_space<vmem>>, vector<1x128xf32>
    %44 = vector.broadcast %43 : vector<1x128xf32> to vector<8x128xf32>
    %45 = arith.addf %42, %44 : vector<8x128xf32>
    %c0_28 = arith.constant 0 : index
    %c0_29 = arith.constant 0 : index
    %46 = vector.load %arg12[%c0_28, %c0_29] : memref<8x128xf32, #tpu.memory_space<vmem>>, vector<8x128xf32>
    tpu.vector_store %arg12[%c0_28, %c0_29], %45 {strides = array<i32>} : memref<8x128xf32, #tpu.memory_space<vmem>>, vector<8x128xf32>,
    return
  }
  func.func @transform_0(%arg0: i32) -> (i32, i32) {
    %c0_i32 = arith.constant 0 : i32
    %c0_i32_0 = arith.constant 0 : i32
    return %arg0, %c0_i32 : i32, i32
  }
  func.func @transform_1(%arg0: i32) -> (i32, i32) {
    %c0_i32 = arith.constant 0 : i32
    %c0_i32_0 = arith.constant 0 : i32
    %c0_i32_1 = arith.constant 0 : i32
    return %c0_i32, %c0_i32_0 : i32, i32
  }
  func.func @transform_2(%arg0: i32) -> (i32, i32) {
    %c0_i32 = arith.constant 0 : i32
    %c0_i32_0 = arith.constant 0 : i32
    %c0_i32_1 = arith.constant 0 : i32
    return %c0_i32, %c0_i32_0 : i32, i32
  }
  func.func @transform_3(%arg0: i32) -> (i32, i32) {
    %c0_i32 = arith.constant 0 : i32
    %c0_i32_0 = arith.constant 0 : i32
    %c0_i32_1 = arith.constant 0 : i32
    return %c0_i32, %c0_i32_0 : i32, i32
  }
  func.func @transform_4(%arg0: i32) -> (i32, i32) {
    %c0_i32 = arith.constant 0 : i32
    %c0_i32_0 = arith.constant 0 : i32
    %c0_i32_1 = arith.constant 0 : i32
    return %c0_i32, %c0_i32_0 : i32, i32
  }
  func.func @transform_5(%arg0: i32) -> (i32, i32) {
    %c0_i32 = arith.constant 0 : i32
    %c0_i32_0 = arith.constant 0 : i32
    %c0_i32_1 = arith.constant 0 : i32
    return %c0_i32, %c0_i32_0 : i32, i32
  }
  func.func @transform_6(%arg0: i32) -> (i32, i32) {
    %c0_i32 = arith.constant 0 : i32
    %c0_i32_0 = arith.constant 0 : i32
    %c0_i32_1 = arith.constant 0 : i32
    return %c0_i32, %c0_i32_0 : i32, i32
  }
  func.func @transform_7(%arg0: i32) -> (i32, i32) {
    %c0_i32 = arith.constant 0 : i32
    %c0_i32_0 = arith.constant 0 : i32
    %c0_i32_1 = arith.constant 0 : i32
    return %c0_i32, %c0_i32_0 : i32, i32
  }
  func.func @transform_8(%arg0: i32) -> (i32, i32) {
    %c0_i32 = arith.constant 0 : i32
    %c0_i32_0 = arith.constant 0 : i32
    %c0_i32_1 = arith.constant 0 : i32
    return %c0_i32, %c0_i32_0 : i32, i32
  }
  func.func @transform_9(%arg0: i32) -> (i32, i32) {
    %c0_i32 = arith.constant 0 : i32
    %c0_i32_0 = arith.constant 0 : i32
    %c0_i32_1 = arith.constant 0 : i32
    return %c0_i32, %c0_i32_0 : i32, i32
  }
  func.func @transform_10(%arg0: i32) -> (i32, i32) {
    %c0_i32 = arith.constant 0 : i32
    %c0_i32_0 = arith.constant 0 : i32
    %c0_i32_1 = arith.constant 0 : i32
    return %c0_i32, %c0_i32_0 : i32, i32
  }
  func.func @transform_11(%arg0: i32) -> (i32, i32) {
    %c0_i32 = arith.constant 0 : i32
    %c0_i32_0 = arith.constant 0 : i32
    return %arg0, %c0_i32 : i32, i32
  }
}

</mosaic_0001>

<bundles_post_ra>
// kernel: tpu_custom_call.1
= control target key start
LH: loop header
LB: loop body
LE: loop exit
PB: predicated region body
PF: predicated region fallthrough
CT: control target
= control target key end

     0   :  { %16 = vsyncpa [#allocation3], 0  ;;  %s1635_s0 = inlined_call_operand.hbm [shape: f32[8,42], index: 0, kind: input, shape index: {}]   ;;  %s1636_s1 = inlined_call_operand.hbm [shape: bf16[42,1024], index: 1, kind: input, shape index: {}]   ;;  %s1637_s2 = inlined_call_operand.hbm [shape: f32[1,1024], index: 2, kind: input, shape index: {}]   ;;  %s1638_s3 = inlined_call_operand.hbm [shape: bf16[256,128], index: 3, kind: input, shape index: {}]   ;;  %s1639_s4 = inlined_call_operand.vmem [shape: f32[1,128], index: 4, kind: input, shape index: {}]   ;;  %s1640_s5 = inlined_call_operand.hbm [shape: bf16[128,128], index: 5, kind: input, shape index: {}]   ;;  %s1641_s6 = inlined_call_operand.vmem [shape: f32[1,128], index: 6, kind: input, shape index: {}]   ;;  %s1642_s7 = inlined_call_operand.hbm [shape: bf16[128,128], index: 7, kind: input, shape index: {}]   ;;  %s1643_s8 = inlined_call_operand.vmem [shape: f32[1,128], index: 8, kind: input, shape index: {}]   ;;  %s1644_s9 = inlined_call_operand.hbm [shape: bf16[128,128], index: 9, kind: input, shape index: {}]   ;;  %s1645_s10 = inlined_call_operand.vmem [shape: f32[1,128], index: 10, kind: input, shape index: {}]   ;;  %s1646_s11 = inlined_call_operand.hbm [shape: f32[8,128], index: 11, kind: output, shape index: {}]  }
   0x1   :  { %17 = vsyncpa [#allocation6], 0 }
   0x2   :  { %18 = vsyncpa [#allocation9], 0 }
   0x3   :  { %19 = vsyncpa [#allocation12], 0 }
   0x4   :  { %20 = vsyncpa [#allocation4], 0  ;;  %s1466_s17 = smov [#allocation5]  }
   0x5   :  { %s36_s18 = sshll.u32 %s1466_s17, 4  ;;  %s37_s18 = int_to_ptr.vmem [resolvable:$true] %s36_s18 }
   0x6   :  { %s1304_s19 = scalar_lea.vmem %s37_s18, 3072  ;;  %p1309_p1 = scmp.lt.s32.totalorder %s37_s18, %s37_s18 }
   0x7   :  { %p1305_p0 = scmp.ne.s32.totalorder %s37_s18, %s1304_s19  ;;  %p1310_p2 = scmp.lt.s32.totalorder %s1304_s19, %s1304_s19 }
   0x9   :  { %p1311_p3 = por %p1310_p2, %p1309_p1 }
   0xb   :  { %p1312_p4 = pnand %p1311_p3, %p1305_p0 }
   0xd   :  { %1315 = shalt.err (!%p1312_p4)
}
   0xe   :  { %s1467_s20 = smov 512   ;;  %s1468_s21 = smov 32  }
   0xf   :  { %42 = dma.hbm_to_vmem [thread:$0]  %s1636_s1, 3072, %s37_s18, [#allocation6], %s1467_s20, %s1467_s20, %s1468_s21  }
  0x10   :  { %s1469_s24 = smov [#allocation8]  }
  0x11   :  { %s58_s25 = sshll.u32 %s1469_s24, 4  ;;  %s59_s25 = int_to_ptr.vmem [resolvable:$true] %s58_s25 }
  0x12   :  { %s1324_s26 = scalar_lea.vmem %s59_s25, 2048  ;;  %p1329_p6 = scmp.lt.s32.totalorder %s59_s25, %s59_s25 }
  0x13   :  { %p1325_p5 = scmp.ne.s32.totalorder %s59_s25, %s1324_s26  ;;  %p1330_p7 = scmp.lt.s32.totalorder %s1324_s26, %s1324_s26 }
  0x15   :  { %p1331_p8 = por %p1330_p7, %p1329_p6 }
  0x17   :  { %p1332_p9 = pnand %p1331_p8, %p1325_p5 }
  0x19   :  { %1335 = shalt.err (!%p1332_p9)
}
  0x1a   :  { %s1470_s27 = smov 64   ;;  %s1471_s28 = smov 4  }
  0x1b   :  { %64 = dma.hbm_to_vmem [thread:$0]  %s1638_s3, 2048, %s59_s25, [#allocation9], %s1470_s27, %s1470_s27, %s1471_s28  }
  0x1c   :  { %s1472_s1 = smov [#allocation11]   ;;  %s1473_s13 = smov [#allocation2]  }
  0x1d   :  { %s86_s12 = sshll.u32 %s1472_s1, 4  ;;  %s27_s14 = sshll.u32 %s1473_s13, 4  ;;  %s87_s12 = int_to_ptr.vmem [resolvable:$true] %s86_s12  ;;  %s28_s14 = int_to_ptr.vmem [resolvable:$true] %s27_s14 }
  0x1e   :  { %s1344_s15 = scalar_lea.vmem %s87_s12, 1024  ;;  %p1349_p11 = scmp.lt.s32.totalorder %s87_s12, %s87_s12 }
  0x1f   :  { %p1345_p10 = scmp.ne.s32.totalorder %s87_s12, %s1344_s15  ;;  %p1350_p12 = scmp.lt.s32.totalorder %s1344_s15, %s1344_s15 }
  0x21   :  { %p1351_p13 = por %p1350_p12, %p1349_p11 }
  0x23   :  { %p1352_p0 = pnand %p1351_p13, %p1345_p10 }
  0x25   :  { %1355 = shalt.err (!%p1352_p0)
}
  0x26   :  { %92 = dma.hbm_to_vmem [thread:$0]  %s1642_s7, 1024, %s87_s12, [#allocation12], %s1470_s27, %s1470_s27, %s1471_s28  }
  0x27   :  { %s1364_s3 = scalar_lea.vmem %s28_s14, 128  ;;  %p1369_p2 = scmp.lt.s32.totalorder %s28_s14, %s28_s14 }
  0x28   :  { %p1365_p1 = scmp.ne.s32.totalorder %s28_s14, %s1364_s3  ;;  %p1370_p3 = scmp.lt.s32.totalorder %s1364_s3, %s1364_s3 }
  0x2a   :  { %p1371_p4 = por %p1370_p3, %p1369_p2 }
  0x2c   :  { %p1372_p5 = pnand %p1371_p4, %p1365_p1 }
  0x2e   :  { %1375 = shalt.err (!%p1372_p5)
}
  0x2f   :  { %30 = dma.hbm_to_vmem [thread:$0]  %s1635_s0, 128, %s28_s14, [#allocation3]  }
  0x30   :  { %s1474_s20 = smov [#allocation7]   ;;  %s1475_s22 = smov [#allocation10]  }
  0x31   :  { %s49_s21 = sshll.u32 %s1474_s20, 4  ;;  %s72_s23 = sshll.u32 %s1475_s22, 4  ;;  %s50_s21 = int_to_ptr.vmem [resolvable:$true] %s49_s21  ;;  %s73_s23 = int_to_ptr.vmem [resolvable:$true] %s72_s23 }
  0x32   :  { %s1384_s24 = scalar_lea.vmem %s50_s21, 128  ;;  %p1389_p7 = scmp.lt.s32.totalorder %s50_s21, %s50_s21 }
  0x33   :  { %p1385_p6 = scmp.ne.s32.totalorder %s50_s21, %s1384_s24  ;;  %p1390_p8 = scmp.lt.s32.totalorder %s1384_s24, %s1384_s24 }
  0x35   :  { %p1391_p9 = por %p1390_p8, %p1389_p7 }
  0x37   :  { %p1392_p10 = pnand %p1391_p9, %p1385_p6 }
  0x39   :  { %1395 = shalt.err (!%p1392_p10)
}
  0x3a   :  { %52 = dma.hbm_to_vmem [thread:$0]  %s1637_s2, 128, %s50_s21, [#allocation6]  }
  0x3b   :  { %s1404_s26 = scalar_lea.vmem %s73_s23, 1024  ;;  %p1409_p12 = scmp.lt.s32.totalorder %s73_s23, %s73_s23 }
  0x3c   :  { %p1405_p11 = scmp.ne.s32.totalorder %s73_s23, %s1404_s26  ;;  %p1410_p13 = scmp.lt.s32.totalorder %s1404_s26, %s1404_s26 }
  0x3e   :  { %p1411_p0 = por %p1410_p13, %p1409_p12 }
  0x40   :  { %p1412_p1 = pnand %p1411_p0, %p1405_p11 }
  0x42   :  { %1415 = shalt.err (!%p1412_p1)
}
  0x43   :  { %78 = dma.hbm_to_vmem [thread:$0]  %s1640_s5, 1024, %s73_s23, [#allocation9], %s1470_s27, %s1470_s27, %s1471_s28  }
  0x44   :  { %s1476_s30 = smov [#allocation13]  }
  0x45   :  { %s100_s1 = sshll.u32 %s1476_s30, 4  ;;  %s101_s1 = int_to_ptr.vmem [resolvable:$true] %s100_s1 }
  0x46   :  { %s1424_s12 = scalar_lea.vmem %s101_s1, 1024  ;;  %p1429_p3 = scmp.lt.s32.totalorder %s101_s1, %s101_s1 }
  0x47   :  { %p1425_p2 = scmp.ne.s32.totalorder %s101_s1, %s1424_s12  ;;  %p1430_p4 = scmp.lt.s32.totalorder %s1424_s12, %s1424_s12 }
  0x49   :  { %p1431_p5 = por %p1430_p4, %p1429_p3 }
  0x4b   :  { %p1432_p6 = pnand %p1431_p5, %p1425_p2 }
  0x4d   :  { %1435 = shalt.err (!%p1432_p6)
}
  0x4e   :  { %106 = dma.hbm_to_vmem [thread:$0]  %s1644_s9, 1024, %s101_s1, [#allocation12], %s1470_s27, %s1470_s27, %s1471_s28  }
  0x4f   :  { %1456 = dma.done.wait [#allocation3], 128  }
  0x50   :  { %1457 = vsyncadd [#allocation3], 4294967168 }
  0x51   :  { %1458 = dma.done.wait [#allocation6], 3200  }
  0x52   :  { %1459 = vsyncadd [#allocation6], 4294964096 }
  0x53   :  { %1460 = dma.done.wait [#allocation9], 3072  }
  0x54   :  { %1461 = vsyncadd [#allocation9], 4294964224 }
  0x55   :  { %1462 = dma.done.wait [#allocation12], 2048  }
  0x56   :  { %1463 = vsyncadd [#allocation12], 4294965248  ;;  %v1477_v0 = vmov 0   ;;  %v149_v1 = vld [vmem:[#allocation5 + $0x80] sm:$0xff]  ;;  %vm315_vm0 = vcmask 1044480   ;;  %v150_v3 = vld [vmem:[#allocation5 + $0x88] sm:$0xff] }
  0x57   :  { %372 = vmatprep.mubr.bf16.mxu0 %v1477_v0  ;;  %413 = vmatprep.mubr.bf16.mxu1 %v1477_v0  ;;  %v153_v2 = vld [vmem:[#allocation5 + $0xa0] sm:$0x11]  ;;  %v154_v5 = vld [vmem:[#allocation5 + $0xa8] sm:$0x11]  ;;  %v151_v22 = vld [vmem:[#allocation5 + $0x90] sm:$0xff]  ;;  %vm311_vm1 = vcmask 343040  }
  0x58   :  { %v1071_v4 = vcombine.high %v149_v1, %v153_v2  ;;  %v1070_v6 = vcombine.low %v149_v1, %v153_v2  ;;  %v141_v7 = vld [vmem:[#allocation5 + $0x40] sm:$0xff]  ;;  %v1073_v9 = vcombine.high %v150_v3, %v154_v5  ;;  %v1072_v10 = vcombine.low %v150_v3, %v154_v5  ;;  %v142_v12 = vld [vmem:[#allocation5 + $0x48] sm:$0xff]  ;;  %v155_v25 = vld [vmem:[#allocation5 + $0xb0] sm:$0x11]  ;;  %s1480_s16 = smov [#allocation14]  }
  0x59   :  { %v145_v8 = vld [vmem:[#allocation5 + $0x60] sm:$0xff]  ;;  %v146_v13 = vld [vmem:[#allocation5 + $0x68] sm:$0xff]  ;;  %v152_v26 = vld [vmem:[#allocation5 + $0x98] sm:$0xff]  ;;  %v1074_v31 = vcombine.low %v151_v22, %v155_v25  ;;  %v1075_v36 = vcombine.high %v151_v22, %v155_v25  ;;  %vm1479_vm2 = vmmov 0   ;;  %s1042_s17 = sshll.u32 %s1480_s16, 4  ;;  %s1043_s17 = int_to_ptr.vmem [resolvable:$true] %s1042_s17 }
  0x5a   :  { %v1063_v11 = vcombine.high %v141_v7, %v145_v8  ;;  %v133_v14 = vld [vmem:[#allocation5] sm:$0xff]  ;;  %1078 = vmatprep.subr.msk.bf16.mxu0 %vm315_vm0, %v1071_v4  ;;  %v317_v15 = vsel %vm315_vm0, %v1070_v6, 0  ;;  %v1065_v16 = vcombine.high %v142_v12, %v146_v13  ;;  %v134_v18 = vld [vmem:[#allocation5 + $0x8] sm:$0xff]  ;;  %1080 = vmatprep.subr.msk.bf16.mxu1 %vm315_vm0, %v1073_v9  ;;  %v323_v20 = vsel %vm315_vm0, %v1072_v10, 0  ;;  %v156_v27 = vld [vmem:[#allocation5 + $0xb8] sm:$0x11]  ;;  %p1441_p8 = scmp.lt.s32.totalorder %s1043_s17, %s1043_s17 }
  0x5b   :  { %v137_v17 = vld [vmem:[#allocation5 + $0x20] sm:$0xff]  ;;  %v138_v19 = vld [vmem:[#allocation5 + $0x28] sm:$0xff]  ;;  %351 = vmatpush1.bf16.msra.mxu0 %v317_v15  ;;  %v1062_v21 = vcombine.low %v141_v7, %v145_v8  ;;  %392 = vmatpush1.bf16.msra.mxu1 %v323_v20  ;;  %v1064_v23 = vcombine.low %v142_v12, %v146_v13  ;;  %v131_v29 = vld [vmem:[#allocation2] sm:$0xff]  ;;  %v1076_v32 = vcombine.low %v152_v26, %v156_v27  ;;  %v329_v41 = vsel %vm315_vm0, %v1074_v31, 0 }
  0x5c   :  { %352 = vmatprep.subr.bf16.mxu0 %v1063_v11  ;;  %v1055_v24 = vcombine.high %v133_v14, %v137_v17  ;;  %393 = vmatprep.subr.bf16.mxu1 %v1065_v16  ;;  %v1057_v28 = vcombine.high %v134_v18, %v138_v19  ;;  %v1054_v30 = vcombine.low %v133_v14, %v137_v17  ;;  %v143_v33 = vld [vmem:[#allocation5 + $0x50] sm:$0xff]  ;;  %v144_v38 = vld [vmem:[#allocation5 + $0x58] sm:$0xff]  ;;  %v1254_v53 = vld [vmem:[#allocation8 + $0x78] sm:$0xff]   ;;  %v1478_v8 = vmov 0.0  }
  0x5d   :  { %v147_v34 = vld [vmem:[#allocation5 + $0x70] sm:$0xff]  ;;  %v1056_v35 = vcombine.low %v134_v18, %v138_v19  ;;  %v1077_v37 = vcombine.high %v152_v26, %v156_v27  ;;  %v132_v39 = vpack.c.bf16 %v131_v29, %v131_v29  ;;  %v148_v40 = vld [vmem:[#allocation5 + $0x78] sm:$0xff]  ;;  %v335_v42 = vsel %vm315_vm0, %v1076_v32, 0  ;;  %v1255_v56 = vld [vmem:[#allocation8 + $0x38] sm:$0xff]  }
  0x5e   :  { %v135_v43 = vld [vmem:[#allocation5 + $0x10] sm:$0xff]  ;;  %v1067_v45 = vcombine.high %v143_v33, %v147_v34  ;;  %v136_v46 = vld [vmem:[#allocation5 + $0x18] sm:$0xff]  ;;  %v1069_v48 = vcombine.high %v144_v38, %v148_v40  ;;  %v1066_v49 = vcombine.low %v143_v33, %v147_v34  ;;  %v1068_v50 = vcombine.low %v144_v38, %v148_v40  ;;  %v1260_v61 = vld [vmem:[#allocation8 + $0x60] sm:$0xff]  }
  0x5f   :  { %353 = vmatpush1.bf16.msra.mxu0 %v1062_v21  ;;  %394 = vmatpush1.bf16.msra.mxu1 %v1064_v23  ;;  %v139_v44 = vld [vmem:[#allocation5 + $0x30] sm:$0xff]  ;;  %v140_v47 = vld [vmem:[#allocation5 + $0x38] sm:$0xff]  ;;  %v1261_v62 = vld [vmem:[#allocation8 + $0x20] sm:$0xff]   ;;  %v159_v13 = vlaneseq }
  0x60   :  { %354 = vmatprep.subr.bf16.mxu0 %v1055_v24  ;;  %395 = vmatprep.subr.bf16.mxu1 %v1057_v28  ;;  %v1059_v51 = vcombine.high %v135_v43, %v139_v44  ;;  %v1061_v52 = vcombine.high %v136_v46, %v140_v47  ;;  %v1058_v54 = vcombine.low %v135_v43, %v139_v44  ;;  %v1256_v57 = vld [vmem:[#allocation8 + $0x70] sm:$0xff]   ;;  %v1258_v59 = vld [vmem:[#allocation8 + $0x68] sm:$0xff]   ;;  %v1262_v63 = vld [vmem:[#allocation8 + $0x58] sm:$0xff]  }
  0x61   :  { %v1060_v55 = vcombine.low %v136_v46, %v140_v47  ;;  %v1257_v58 = vld [vmem:[#allocation8 + $0x30] sm:$0xff]   ;;  %v1259_v60 = vld [vmem:[#allocation8 + $0x28] sm:$0xff]   ;;  %v1268_v5 = vld [vmem:[#allocation8 + $0x40] sm:$0xff]   ;;  %v160_v14 = vshrl.u32 %v159_v13, 7 }
  0x62   :  { %v1264_v1 = vld [vmem:[#allocation8 + $0x50] sm:$0xff]   ;;  %v1266_v3 = vld [vmem:[#allocation8 + $0x48] sm:$0xff]   ;;  %v1269_v6 = vld [vmem:[#allocation8] sm:$0xff]  }
  0x63   :  { %355 = vmatpush1.bf16.msra.mxu0 %v1054_v30  ;;  %396 = vmatpush1.bf16.msra.mxu1 %v1056_v35  ;;  %v1265_v2 = vld [vmem:[#allocation8 + $0x10] sm:$0xff]   ;;  %v1267_v4 = vld [vmem:[#allocation8 + $0x8] sm:$0xff]   ;;  %v1270_v7 = vld [vmem:[#allocation10 + $0x38] sm:$0xff]   ;;  %v161_v18 = vsub.s32 0, %v160_v14  ;;  %v169_v19 = vsub.s32 2, %v160_v14  ;;  %v165_v22 = vsub.s32 1, %v160_v14 }
  0x64   :  { %1082 = vmatprep.subr.msk.bf16.mxu0 %vm315_vm0, %v1075_v36  ;;  %1084 = vmatprep.subr.msk.bf16.mxu1 %vm315_vm0, %v1077_v37  ;;  %v1271_v9 = vld [vmem:[#allocation10 + $0x30] sm:$0xff]   ;;  %v1272_v10 = vld [vmem:[#allocation10 + $0x28] sm:$0xff]   ;;  %v1273_v11 = vld [vmem:[#allocation10 + $0x20] sm:$0xff]   ;;  %v173_v23 = vsub.s32 3, %v160_v14  ;;  %v177_v26 = vsub.s32 4, %v160_v14  ;;  %v185_v28 = vsub.s32 6, %v160_v14 }
  0x65   :  { %v1274_v12 = vld [vmem:[#allocation10 + $0x18] sm:$0xff]   ;;  %v181_v32 = vsub.s32 5, %v160_v14  ;;  %v189_v35 = vsub.s32 7, %v160_v14  ;;  %v1279_v13 = vld [vmem:[#allocation11 + $0x30] sm:$0xff]   ;;  %v1280_v14 = vld [vmem:[#allocation11 + $0x28] sm:$0xff]  }
  0x66   :  { %1079 = vmatmul.mubr.msk.bf16.vlgmr.msra.gmra.mxu0 %vm311_vm1, %v132_v39  ;;  %1081 = vmatmul.mubr.msk.bf16.vlgmr.msra.gmra.mxu1 %vm311_vm1, %v132_v39  ;;  %v157_v21 = vld [vmem:[#allocation7] sm:$0xff] }
  0x67   :  { %433 = vmatpush1.bf16.msra.mxu0 %v329_v41  ;;  %474 = vmatpush1.bf16.msra.mxu1 %v335_v42  ;;  %v162_v29 = vrot.slane %v157_v21, %v161_v18  ;;  %v170_v30 = vrot.slane %v157_v21, %v169_v19  ;;  %v166_v33 = vrot.slane %v157_v21, %v165_v22  ;;  %v1086_v19 = vld [vmem:[%s1639_s4] ss:$0 sm:$0xff] }
  0x68   :  { %434 = vmatprep.subr.bf16.mxu0 %v1067_v45  ;;  %475 = vmatprep.subr.bf16.mxu1 %v1069_v48  ;;  %v174_v34 = vrot.slane %v157_v21, %v173_v23  ;;  %v178_v36 = vrot.slane %v157_v21, %v177_v26  ;;  %v186_v37 = vrot.slane %v157_v21, %v185_v28  ;;  %v1285_v28 = vld [vmem:[#allocation11] sm:$0xff]  }
  0x69   :  { %454 = vmatprep.mubr.bf16.mxu0 %v1477_v0  ;;  %495 = vmatprep.mubr.bf16.mxu1 %v1477_v0  ;;  %v1263_v0 = vld [vmem:[#allocation8 + $0x18] sm:$0xff]   ;;  %v182_v40 = vrot.slane %v157_v21, %v181_v32  ;;  %v190_v44 = vrot.slane %v157_v21, %v189_v35  ;;  %v1103_v32 = vld [vmem:[%s1641_s6] ss:$0 sm:$0xff] }
  0x6b   :  { %435 = vmatpush1.bf16.msra.mxu0 %v1066_v49  ;;  %476 = vmatpush1.bf16.msra.mxu1 %v1068_v50 }
  0x6c   :  { %436 = vmatprep.subr.bf16.mxu0 %v1059_v51  ;;  %477 = vmatprep.subr.bf16.mxu1 %v1061_v52 }
  0x6f   :  { %437 = vmatpush1.bf16.msra.mxu0 %v1058_v54  ;;  %478 = vmatpush1.bf16.msra.mxu1 %v1060_v55 }
  0x70   :  { %1130 = vmatprep.subr.bf16.mxu0 %v1254_v53  ;;  %1179 = vmatprep.subr.bf16.mxu1 %v1478_v8 }
  0x72   :  { %1083 = vmatmul.mubr.msk.bf16.vlgmr.msra.gmra.mxu0 %vm311_vm1, %v132_v39  ;;  %1085 = vmatmul.mubr.msk.bf16.vlgmr.msra.gmra.mxu1 %vm311_vm1, %v132_v39 }
  0x73   :  { %1131 = vmatpush3.bf16.msra.mxu0 %v1255_v56  ;;  %1180 = vmatpush3.bf16.msra.mxu1 %v1270_v7 }
  0x74   :  { %1132 = vmatprep.subr.bf16.mxu0 %v1256_v57  ;;  %1181 = vmatprep.subr.bf16.mxu1 %v1478_v8 }
  0x75   :  { %1195 = vmatprep.mubr.msk.bf16.mxu1 %vm1479_vm2, %v1478_v8 }
  0x77   :  { %1133 = vmatpush3.bf16.msra.mxu0 %v1257_v58  ;;  %1182 = vmatpush3.bf16.msra.mxu1 %v1271_v9  ;;  %v1275_v9 = vld [vmem:[#allocation10 + $0x10] sm:$0xff]  }
  0x78   :  { %1134 = vmatprep.subr.bf16.mxu0 %v1258_v59  ;;  %1183 = vmatprep.subr.bf16.mxu1 %v1478_v8 }
  0x7b   :  { %1135 = vmatpush3.bf16.msra.mxu0 %v1259_v60  ;;  %1184 = vmatpush3.bf16.msra.mxu1 %v1272_v10  ;;  %v1276_v10 = vld [vmem:[#allocation10 + $0x8] sm:$0xff]  }
  0x7c   :  { %1136 = vmatprep.subr.bf16.mxu0 %v1260_v61  ;;  %1185 = vmatprep.subr.bf16.mxu1 %v1478_v8 }
  0x7f   :  { %1137 = vmatpush3.bf16.msra.mxu0 %v1261_v62  ;;  %1186 = vmatpush3.bf16.msra.mxu1 %v1273_v11  ;;  %v1277_v11 = vld [vmem:[#allocation10] sm:$0xff]  }
  0x80   :  { %1138 = vmatprep.subr.bf16.mxu0 %v1262_v63  ;;  %1187 = vmatprep.subr.bf16.mxu1 %v1478_v8 }
  0x83   :  { %1139 = vmatpush3.bf16.msra.mxu0 %v1263_v0  ;;  %1188 = vmatpush3.bf16.msra.mxu1 %v1274_v12  ;;  %v1278_v12 = vld [vmem:[#allocation11 + $0x38] sm:$0xff]  }
  0x84   :  { %1140 = vmatprep.subr.bf16.mxu0 %v1264_v1  ;;  %1189 = vmatprep.subr.bf16.mxu1 %v1478_v8 }
  0x87   :  { %1141 = vmatpush3.bf16.msra.mxu0 %v1265_v2  ;;  %1190 = vmatpush3.bf16.msra.mxu1 %v1275_v9 }
  0x88   :  { %1142 = vmatprep.subr.bf16.mxu0 %v1266_v3  ;;  %1191 = vmatprep.subr.bf16.mxu1 %v1478_v8 }
  0x8b   :  { %1143 = vmatpush3.bf16.msra.mxu0 %v1267_v4  ;;  %1192 = vmatpush3.bf16.msra.mxu1 %v1276_v10 }
  0x8c   :  { %1144 = vmatprep.subr.bf16.mxu0 %v1268_v5  ;;  %1193 = vmatprep.subr.bf16.mxu1 %v1478_v8 }
  0x8f   :  { %1145 = vmatpush3.bf16.msra.mxu0 %v1269_v6  ;;  %1194 = vmatpush3.bf16.msra.mxu1 %v1277_v11 }
  0x90   :  { %1199 = vmatprep.subr.bf16.mxu0 %v1478_v8  ;;  %1219 = vmatprep.subr.bf16.mxu1 %v1478_v8 }
 0x126   :  { %v374_v15 = vpop.f32.mrf.mxu0  ;;  %v415_v16 = vpop.f32.mrf.mxu1 }
 0x127   :  { %v375_v38 = vadd.f32 %v374_v15, %v162_v29  ;;  %v416_v39 = vadd.f32 %v415_v16, %v170_v30  ;;  %v1281_v15 = vld [vmem:[#allocation11 + $0x20] sm:$0xff]   ;;  %v1282_v16 = vld [vmem:[#allocation11 + $0x18] sm:$0xff]   ;;  %v1287_v30 = vld [vmem:[#allocation13 + $0x30] sm:$0xff]  }
 0x128   :  { %v376_v17 = vpop.f32.mrf.mxu0  ;;  %v417_v20 = vpop.f32.mrf.mxu1  ;;  %v1286_v29 = vld [vmem:[#allocation13 + $0x38] sm:$0xff]  }
 0x129   :  { %v377_v41 = vadd.f32 %v376_v17, %v166_v33  ;;  %v418_v42 = vadd.f32 %v417_v20, %v174_v34  ;;  %v504_v49 = vmax.f32 %v375_v38, 0.0  ;;  %v506_v50 = vmax.f32 %v416_v39, 0.0  ;;  %v1283_v17 = vld [vmem:[#allocation11 + $0x10] sm:$0xff]  }
 0x12a   :  { %v378_v24 = vpop.f32.mrf.mxu0  ;;  %v419_v25 = vpop.f32.mrf.mxu1 }
 0x12b   :  { %v505_v54 = vmax.f32 %v377_v41, 0.0  ;;  %v507_v55 = vmax.f32 %v418_v42, 0.0  ;;  %v512_v0 = vmax.f32 %v504_v49, %v506_v50  ;;  %v1289_v41 = vld [vmem:[#allocation13 + $0x20] sm:$0xff]   ;;  %v1290_v42 = vld [vmem:[#allocation13 + $0x18] sm:$0xff]  }
 0x12c   :  { %v379_v27 = vpop.f32.mrf.mxu0  ;;  %v420_v31 = vpop.f32.mrf.mxu1 }
 0x12d   :  { %v513_v2 = vmax.f32 %v505_v54, %v507_v55  ;;  %v1284_v27 = vld [vmem:[#allocation11 + $0x8] sm:$0xff]   ;;  %v1121_v54 = vld [vmem:[%s1645_s10] ss:$0 sm:$0xff] }
 0x12e   :  { %v1288_v31 = vld [vmem:[#allocation13 + $0x28] sm:$0xff]  }
 0x132   :  { %v456_v43 = vpop.f32.mrf.mxu0  ;;  %v497_v46 = vpop.f32.mrf.mxu1 }
 0x133   :  { %v457_v45 = vadd.f32 %v456_v43, %v178_v36  ;;  %v498_v47 = vadd.f32 %v497_v46, %v186_v37  ;;  %v1291_v43 = vld [vmem:[#allocation13 + $0x10] sm:$0xff]  }
 0x134   :  { %v458_v48 = vpop.f32.mrf.mxu0  ;;  %v499_v53 = vpop.f32.mrf.mxu1  ;;  %v1112_v46 = vld [vmem:[%s1643_s8] ss:$0 sm:$0xff]  ;;  %s1436_s8 = scalar_lea.vmem %s1043_s17, 128 }
 0x135   :  { %v508_v51 = vmax.f32 %v457_v45, 0.0  ;;  %v459_v52 = vadd.f32 %v458_v48, %v182_v40  ;;  %v510_v56 = vmax.f32 %v498_v47, 0.0  ;;  %v500_v57 = vadd.f32 %v499_v53, %v190_v44  ;;  %v1292_v44 = vld [vmem:[#allocation13 + $0x8] sm:$0xff]   ;;  %v1293_v45 = vld [vmem:[#allocation13] sm:$0xff]   ;;  %p1437_p7 = scmp.ne.s32.totalorder %s1043_s17, %s1436_s8  ;;  %p1442_p9 = scmp.lt.s32.totalorder %s1436_s8, %s1436_s8 }
 0x136   :  { %v460_v58 = vpop.f32.mrf.mxu0  ;;  %v501_v60 = vpop.f32.mrf.mxu1 }
 0x137   :  { %v509_v59 = vmax.f32 %v459_v52, 0.0  ;;  %v514_v61 = vmax.f32 %v508_v51, %v510_v56  ;;  %v511_v62 = vmax.f32 %v500_v57, 0.0  ;;  %p1443_p10 = por %p1442_p9, %p1441_p8 }
 0x138   :  { %v461_v63 = vpop.f32.mrf.mxu0  ;;  %v502_v1 = vpop.f32.mrf.mxu1 }
 0x139   :  { %v515_v3 = vmax.f32 %v509_v59, %v511_v62  ;;  %v516_v4 = vmax.f32 %v512_v0, %v514_v61  ;;  %p1444_p11 = pnand %p1443_p10, %p1437_p7 }
 0x13b   :  { %v517_v5 = vmax.f32 %v513_v2, %v515_v3  ;;  %v518_v7 = vpack.c.bf16 %v516_v4, %v516_v4 }
 0x13d   :  { %v519_v6 = vpack.c.bf16 %v517_v5, %v517_v5 }
 0x13f   :  { %687 = vmatprep.mubr.bf16.mxu0 %v519_v6 }
 0x140   :  { %688 = vmatmul.mubr.bf16.vlgmr.msra.gmra.mxu0 %v518_v7 }
 0x141   :  { %1215 = vmatprep.mubr.msk.bf16.mxu0 %vm1479_vm2, %v1478_v8  ;;  %1200 = vmatpush3.bf16.msra.mxu0 %v1278_v12 }
 0x142   :  { %1201 = vmatprep.subr.bf16.mxu0 %v1478_v8 }
 0x145   :  { %1202 = vmatpush3.bf16.msra.mxu0 %v1279_v13 }
 0x146   :  { %1203 = vmatprep.subr.bf16.mxu0 %v1478_v8 }
 0x149   :  { %1204 = vmatpush3.bf16.msra.mxu0 %v1280_v14 }
 0x14a   :  { %1205 = vmatprep.subr.bf16.mxu0 %v1478_v8 }
 0x14d   :  { %1206 = vmatpush3.bf16.msra.mxu0 %v1281_v15 }
 0x14e   :  { %1207 = vmatprep.subr.bf16.mxu0 %v1478_v8 }
 0x151   :  { %1208 = vmatpush3.bf16.msra.mxu0 %v1282_v16 }
 0x152   :  { %1209 = vmatprep.subr.bf16.mxu0 %v1478_v8 }
 0x155   :  { %1210 = vmatpush3.bf16.msra.mxu0 %v1283_v17 }
 0x156   :  { %1211 = vmatprep.subr.bf16.mxu0 %v1478_v8 }
 0x159   :  { %1212 = vmatpush3.bf16.msra.mxu0 %v1284_v27 }
 0x15a   :  { %1213 = vmatprep.subr.bf16.mxu0 %v1478_v8 }
 0x15d   :  { %1214 = vmatpush3.bf16.msra.mxu0 %v1285_v28 }
 0x200   :  { %v1146_v18 = vpop.f32.mrf.mxu0 }
 0x202   :  { %v1147_v20 = vpop.f32.mrf.mxu0 }
 0x203   :  { %v1148_v21 = vadd.f32 %v1147_v20, %v1146_v18 }
 0x204   :  { %v1149_v22 = vpop.f32.mrf.mxu0 }
 0x205   :  { %v690_v23 = vadd.f32 %v1148_v21, %v1086_v19 }
 0x206   :  { %v1150_v24 = vpop.f32.mrf.mxu0 }
 0x207   :  { %v695_v25 = vmax.f32 %v690_v23, 0.0 }
 0x209   :  { %v696_v26 = vpack.c.bf16 %v695_v25, %v695_v25 }
 0x20b   :  { %1196 = vmatmul.mubr.bf16.vlgmr.msra.gmra.mxu1 %v696_v26 }
 0x20c   :  { %1235 = vmatprep.mubr.msk.bf16.mxu1 %vm1479_vm2, %v1478_v8  ;;  %1220 = vmatpush3.bf16.msra.mxu1 %v1286_v29 }
 0x20d   :  { %1221 = vmatprep.subr.bf16.mxu1 %v1478_v8 }
 0x210   :  { %1222 = vmatpush3.bf16.msra.mxu1 %v1287_v30 }
 0x211   :  { %1223 = vmatprep.subr.bf16.mxu1 %v1478_v8 }
 0x214   :  { %1224 = vmatpush3.bf16.msra.mxu1 %v1288_v31 }
 0x215   :  { %1225 = vmatprep.subr.bf16.mxu1 %v1478_v8 }
 0x218   :  { %1226 = vmatpush3.bf16.msra.mxu1 %v1289_v41 }
 0x219   :  { %1227 = vmatprep.subr.bf16.mxu1 %v1478_v8 }
 0x21c   :  { %1228 = vmatpush3.bf16.msra.mxu1 %v1290_v42 }
 0x21d   :  { %1229 = vmatprep.subr.bf16.mxu1 %v1478_v8 }
 0x220   :  { %1230 = vmatpush3.bf16.msra.mxu1 %v1291_v43 }
 0x221   :  { %1231 = vmatprep.subr.bf16.mxu1 %v1478_v8 }
 0x224   :  { %1232 = vmatpush3.bf16.msra.mxu1 %v1292_v44 }
 0x225   :  { %1233 = vmatprep.subr.bf16.mxu1 %v1478_v8 }
 0x228   :  { %1234 = vmatpush3.bf16.msra.mxu1 %v1293_v45 }
 0x2cb   :  { %v802_v33 = vpop.f32.mrf.mxu1 }
 0x2cc   :  { %v803_v34 = vadd.f32 %v1103_v32, %v802_v33 }
 0x2cd   :  { %v1197_v35 = vpop.f32.mrf.mxu1 }
 0x2ce   :  { %v808_v36 = vmax.f32 %v803_v34, 0.0 }
 0x2cf   :  { %v805_v37 = vpop.f32.mrf.mxu1 }
 0x2d0   :  { %v809_v38 = vadd.f32 %v808_v36, %v695_v25 }
 0x2d1   :  { %v1198_v39 = vpop.f32.mrf.mxu1 }
 0x2d2   :  { %v810_v40 = vpack.c.bf16 %v809_v38, %v809_v38 }
 0x2d4   :  { %1216 = vmatmul.mubr.bf16.vlgmr.msra.gmra.mxu0 %v810_v40 }
 0x394   :  { %v916_v47 = vpop.f32.mrf.mxu0 }
 0x395   :  { %v917_v48 = vadd.f32 %v1112_v46, %v916_v47 }
 0x396   :  { %v1217_v49 = vpop.f32.mrf.mxu0 }
 0x397   :  { %1294 = vtanh.f32 %v917_v48 }
 0x398   :  { %v919_v50 = vpop.f32.mrf.mxu0 }
 0x39a   :  { %v1218_v51 = vpop.f32.mrf.mxu0 }
 0x3a4   :  { %v1295_v52 = vpop.eup %1294 }
 0x3a5   :  { %v923_v53 = vpack.c.bf16 %v1295_v52, %v1295_v52 }
 0x3a7   :  { %1236 = vmatmul.mubr.bf16.vlgmr.msra.gmra.mxu1 %v923_v53 }
 0x467   :  { %v1029_v8 = vpop.f32.mrf.mxu1 }
 0x468   :  { %v1030_v55 = vadd.f32 %v1121_v54, %v1029_v8 }
 0x469   :  { %v1237_v56 = vpop.f32.mrf.mxu1 }
 0x46a   :  { %1035 = vst [vmem:[#allocation14] sm:$0xff] %v1030_v55 }
 0x46b   :  { %v1032_v57 = vpop.f32.mrf.mxu1 }
 0x46c   :  { %1447 = shalt.err (!%p1444_p11)
}
 0x46d   :  { %1045 = dma.vmem_to_hbm [thread:$0]  %s1043_s17, 128, %s1646_s11, [#allocation4]   ;;  %v1238_v58 = vpop.f32.mrf.mxu1 }
 0x46e   :  { %1464 = dma.done.wait [#allocation4], 128  }
 0x46f   :  { %1465 = vsyncadd [#allocation4], 4294967168 }
 0x470   :  { %1049 = vsyncpa [#allocation3], 1 }
 0x471   :  { %1050 = vsyncpa [#allocation6], 1 }
 0x472   :  { %1051 = vsyncpa [#allocation9], 1 }
 0x473   :  { %1052 = vsyncpa [#allocation12], 1 }
 0x474   :  { %1053 = vsyncpa [#allocation4], 1 }

</bundles_post_ra>
